<compile_context>
chip_gen: v7x
topology: tpu7x:2x2x1
jax: 0.10.0
libtpu: 0.0.40
codegen_flags: <defaults>
</compile_context>

<pallas_src>
import math
import functools

import jax
import jax.numpy as jnp
from jax.experimental import pallas as pl
from jax.experimental.pallas import tpu as pltpu


def _attn_kernel(*refs, n_head, hidden_dim, flag):
    """One batch tile per grid step; all heads computed inside."""
    if flag:
        k_ref, q_ref, wkx_ref, pw_ref, pb_ref, o_ref = refs
        wqx_ref = None
    else:
        k_ref, q_ref, wkx_ref, wqx_ref, pw_ref, pb_ref, o_ref = refs

    bt, k_len, E = k_ref.shape
    q_len = q_ref.shape[1]
    out_dim = o_ref.shape[2]

    k3 = k_ref[...]                                   # (bt, k_len, E) f32 (raw keys)
    q3 = q_ref[...]                                   # (bt, q_len, E) f32

    wkx_bf = wkx_ref[...].astype(jnp.bfloat16)        # (E, E)
    pw_bf = pw_ref[...].astype(jnp.bfloat16)          # (E, out_dim)

    # kx = sigmoid(k @ w_kx): one big (bt*k_len, E) x (E, E) MXU matmul.
    k2_bf = k3.reshape(bt * k_len, E).astype(jnp.bfloat16)
    kx = jax.nn.sigmoid(
        jnp.dot(k2_bf, wkx_bf, preferred_element_type=jnp.float32))
    kx = kx.reshape(bt, k_len, E)

    # qx = q (flag=True)  or  sigmoid(q @ w_qx) (flag=False)
    if flag:
        qx = q3
    else:
        q2_bf = q3.reshape(bt * q_len, E).astype(jnp.bfloat16)
        wqx_bf = wqx_ref[...].astype(jnp.bfloat16)
        qx = jax.nn.sigmoid(
            jnp.dot(q2_bf, wqx_bf, preferred_element_type=jnp.float32))
        qx = qx.reshape(bt, q_len, E)

    inv_sqrt_hd = 1.0 / math.sqrt(hidden_dim)

    # Final Linear folded into the per-head loop: accumulate directly into a
    # (bt*q_len, out_dim) f32 accumulator.  No concatenate along lanes.
    proj_acc = jnp.zeros((bt * q_len, out_dim), jnp.float32)

    for h in range(n_head):                           # static unroll; n_head small
        lo = h * hidden_dim
        hi = lo + hidden_dim

        qh = qx[:, :, lo:hi].astype(jnp.bfloat16)     # (bt, q_len, hd)
        kh = kx[:, :, lo:hi].astype(jnp.bfloat16)     # (bt, k_len, hd)
        ksrc = k3[:, :, lo:hi].astype(jnp.bfloat16)   # raw keys: kx_source slice

        # score = (qh @ kh^T) / sqrt(hd), batched over the bt rows in the block.
        score = jnp.einsum('bqd,bkd->bqk', qh, kh,
                           preferred_element_type=jnp.float32) * inv_sqrt_hd

        # numerically stable softmax over k_len (elementwise math in f32)
        score = score - jnp.max(score, axis=-1, keepdims=True)
        p = jnp.exp(score)
        p = p * pl.reciprocal(jnp.sum(p, axis=-1, keepdims=True), approx=True)

        # attention-weighted sum over the raw keys
        oh = jnp.einsum('bqk,bkd->bqd', p.astype(jnp.bfloat16), ksrc,
                        preferred_element_type=jnp.float32)   # (bt, q_len, hd)

        # fold the final Linear: this head's slice of W^T (sublane slice, lane-dense)
        proj_acc = proj_acc + jnp.dot(
            oh.reshape(bt * q_len, hidden_dim).astype(jnp.bfloat16),
            pw_bf[lo:hi, :],
            preferred_element_type=jnp.float32)

    proj = proj_acc.reshape(bt, q_len, out_dim) + pb_ref[0]

    # dropout(p=0) is identity.
    o_ref[...] = proj.astype(o_ref.dtype)


def self_dim_multihead_attention(k, q, w_kx, w_qx, proj_w, proj_b,
                                 *, n_head, flag, block_b=None):
    """Wrapper matching the PyTorch forward (scaled_dot_product path)."""
    if q.ndim == 2:
        q = q[:, None, :]
    if k.ndim == 2:
        k = k[:, None, :]

    mb, k_len, E = k.shape
    q_len = q.shape[1]
    hidden_dim = E // n_head
    out_dim = proj_w.shape[1]

    # Batch tile: whole batch in one step for small mb; 8 rows/step otherwise.
    if block_b is None:
        block_b = mb if mb <= 8 else 8
    pad = (-mb) % block_b
    if pad:
        k = jnp.concatenate([k, jnp.zeros((pad, k_len, E), k.dtype)], axis=0)
        q = jnp.concatenate([q, jnp.zeros((pad, q_len, E), q.dtype)], axis=0)
    mbp = mb + pad
    grid = (mbp // block_b,)

    proj_b2 = proj_b.reshape(1, out_dim)

    kernel = functools.partial(_attn_kernel,
                               n_head=n_head,
                               hidden_dim=hidden_dim,
                               flag=flag)

    in_specs = [
        pl.BlockSpec((block_b, k_len, E), lambda b: (b, 0, 0)),
        pl.BlockSpec((block_b, q_len, E), lambda b: (b, 0, 0)),
        pl.BlockSpec((E, E), lambda b: (0, 0)),
    ]
    args = [k, q, w_kx]
    if not flag:
        # w_qx only DMA'd when it is actually used.
        in_specs.append(pl.BlockSpec((E, E), lambda b: (0, 0)))
        args.append(w_qx)
    in_specs += [
        pl.BlockSpec((E, out_dim), lambda b: (0, 0)),
        pl.BlockSpec((1, out_dim), lambda b: (0, 0)),
    ]
    args += [proj_w, proj_b2]

    out = pl.pallas_call(
        kernel,
        out_shape=jax.ShapeDtypeStruct((mbp, q_len, out_dim), jnp.float32),
        grid=grid,
        in_specs=in_specs,
        out_specs=pl.BlockSpec((block_b, q_len, out_dim), lambda b: (b, 0, 0)),
        compiler_params=pltpu.CompilerParams(dimension_semantics=("parallel",)),
    )(*args)
    return out[:mb]


def _reference(k, q, w_kx, w_qx, proj_w, proj_b, *, n_head, flag):
    """Pure-JAX f32 reference mirroring the PyTorch forward."""
    mb, k_len, E = k.shape
    q_len = q.shape[1]
    hd = E // n_head

    kx_source = k.reshape(mb, k_len, n_head, hd).transpose(0, 2, 1, 3)
    kx = jax.nn.sigmoid(jnp.einsum('bke,ef->bkf', k, w_kx))
    if flag:
        qx = q
    else:
        qx = jax.nn.sigmoid(jnp.einsum('bqe,ef->bqf', q, w_qx))

    k_nhead = kx.reshape(mb, k_len, n_head, hd).transpose(0, 2, 1, 3)
    qx_h = qx.reshape(mb, q_len, n_head, hd).transpose(0, 2, 1, 3)
    score = jnp.einsum('bnqh,bnkh->bnqk', qx_h, k_nhead) / math.sqrt(hd)
    score = jax.nn.softmax(score, axis=-1)
    out = jnp.einsum('bnqk,bnkh->bnqh', score, kx_source)
    out = out.transpose(0, 2, 1, 3).reshape(mb, q_len, n_head * hd)
    return out @ proj_w + proj_b


if __name__ == "__main__":
    # Small shapes consistent with the module.
    embed_dim = 32
    n_head = 2
    hidden_dim = embed_dim // n_head      # 16
    out_dim = embed_dim                   # 32
    mb, k_len, q_len = 2, 8, 8

    key = jax.random.PRNGKey(0)
    k_in, k_q, k_wk, k_wq, k_pw, k_pb = jax.random.split(key, 6)

    stdv = 1.0 / math.sqrt(embed_dim)

    def _row_normed(rng, shape):
        w = jax.random.uniform(rng, shape, jnp.float32, -stdv, stdv)
        # mimic renorm_(2, 1, 1e-5).mul_(1e5): unit L2-norm rows
        return w / jnp.linalg.norm(w, axis=-1, keepdims=True)

    w_kx = _row_normed(k_wk, (embed_dim, embed_dim))
    w_qx = _row_normed(k_wq, (embed_dim, embed_dim))
    # nn.Linear(embed_dim, out_dim): store W^T as (embed_dim, out_dim)
    proj_w = jax.random.uniform(k_pw, (embed_dim, out_dim), jnp.float32, -stdv, stdv)
    proj_b = jax.random.uniform(k_pb, (out_dim,), jnp.float32, -stdv, stdv)

    k = jax.random.normal(k_in, (mb, k_len, embed_dim), jnp.float32)
    q = jax.random.normal(k_q, (mb, q_len, embed_dim), jnp.float32)

    # flag=False path (uses w_qx)
    out_f = self_dim_multihead_attention(k, q, w_kx, w_qx, proj_w, proj_b,
                                         n_head=n_head, flag=False)
    out_f = jax.block_until_ready(out_f)
    ref_f = _reference(k, q, w_kx, w_qx, proj_w, proj_b, n_head=n_head, flag=False)
    assert out_f.shape == (mb, q_len, out_dim)
    # bf16 MXU operands + approx reciprocal -> compare against f32 ref loosely.
    assert jnp.allclose(out_f, ref_f, rtol=5e-2, atol=5e-2), "mismatch (flag=False)"

    # flag=True path (w_qx not passed to the kernel at all)
    out_t = self_dim_multihead_attention(k, q, w_kx, w_qx, proj_w, proj_b,
                                         n_head=n_head, flag=True)
    out_t = jax.block_until_ready(out_t)
    ref_t = _reference(k, q, w_kx, w_qx, proj_w, proj_b, n_head=n_head, flag=True)
    assert jnp.allclose(out_t, ref_t, rtol=5e-2, atol=5e-2), "mismatch (flag=True)"

    print("KERNEL_OK")
</pallas_src>

<mosaic_0001>
module attributes {stable_mosaic.version = 11 : i64} {
  func.func @_attn_kernel(%arg0: i32, %arg1: memref<2x8x32xf32, #tpu.memory_space<vmem>>, %arg2: memref<2x8x32xf32, #tpu.memory_space<vmem>>, %arg3: memref<32x32xf32, #tpu.memory_space<vmem>>, %arg4: memref<32x32xf32, #tpu.memory_space<vmem>>, %arg5: memref<32x32xf32, #tpu.memory_space<vmem>>, %arg6: memref<1x32xf32, #tpu.memory_space<vmem>>, %arg7: memref<2x8x32xf32, #tpu.memory_space<vmem>>) attributes {dimension_semantics = [#tpu.dimension_semantics<parallel>], iteration_bounds = array<i64: 1>, scalar_prefetch = 0 : i64, scratch_operands = 0 : i64, tpu.core_type = #tpu.core_type<tc>, window_params = [{transform_indices = @transform_0, window_bounds = array<i64: 2, 8, 32>}, {transform_indices = @transform_1, window_bounds = array<i64: 2, 8, 32>}, {pipeline_mode = #tpu.pipeline_mode<synchronous>, transform_indices = @transform_2, window_bounds = array<i64: 32, 32>}, {pipeline_mode = #tpu.pipeline_mode<synchronous>, transform_indices = @transform_3, window_bounds = array<i64: 32, 32>}, {pipeline_mode = #tpu.pipeline_mode<synchronous>, transform_indices = @transform_4, window_bounds = array<i64: 32, 32>}, {pipeline_mode = #tpu.pipeline_mode<synchronous>, transform_indices = @transform_5, window_bounds = array<i64: 1, 32>}, {transform_indices = @transform_6, window_bounds = array<i64: 2, 8, 32>}]} {
    %c0 = arith.constant 0 : index
    %c0_0 = arith.constant 0 : index
    %c0_1 = arith.constant 0 : index
    %0 = vector.load %arg1[%c0, %c0_0, %c0_1] : memref<2x8x32xf32, #tpu.memory_space<vmem>>, vector<2x8x32xf32>
    %c0_2 = arith.constant 0 : index
    %c0_3 = arith.constant 0 : index
    %c0_4 = arith.constant 0 : index
    %1 = vector.load %arg2[%c0_2, %c0_3, %c0_4] : memref<2x8x32xf32, #tpu.memory_space<vmem>>, vector<2x8x32xf32>
    %c0_5 = arith.constant 0 : index
    %c0_6 = arith.constant 0 : index
    %2 = vector.load %arg3[%c0_5, %c0_6] : memref<32x32xf32, #tpu.memory_space<vmem>>, vector<32x32xf32>
    %3 = arith.truncf %2 : vector<32x32xf32> to vector<32x32xbf16>
    %c0_7 = arith.constant 0 : index
    %c0_8 = arith.constant 0 : index
    %4 = vector.load %arg5[%c0_7, %c0_8] : memref<32x32xf32, #tpu.memory_space<vmem>>, vector<32x32xf32>
    %5 = arith.truncf %4 : vector<32x32xf32> to vector<32x32xbf16>
    %6 = vector.shape_cast %0 : vector<2x8x32xf32> to vector<16x32xf32>
    %7 = arith.truncf %6 : vector<16x32xf32> to vector<16x32xbf16>
    %cst = arith.constant dense<0.000000e+00> : vector<16x32xf32>
    %8 = tpu.matmul %7, %3, %cst {dimension_numbers = #tpu.dot_dimension_numbers<[1], [0], [0], [1], [0, 0, 1, 1], [], []>} : vector<16x32xbf16>, vector<32x32xbf16>, vector<16x32xf32> -> vector<16x32xf32>
    %9 = arith.negf %8 : vector<16x32xf32>
    %10 = math.exp %9 : vector<16x32xf32>
    %cst_9 = arith.constant 1.000000e+00 : f32
    %11 = vector.broadcast %cst_9 : f32 to vector<16x32xf32>
    %12 = arith.addf %11, %10 : vector<16x32xf32>
    %13 = arith.divf %11, %12 : vector<16x32xf32>
    %14 = vector.shape_cast %13 : vector<16x32xf32> to vector<2x8x32xf32>
    %15 = vector.shape_cast %1 : vector<2x8x32xf32> to vector<16x32xf32>
    %16 = arith.truncf %15 : vector<16x32xf32> to vector<16x32xbf16>
    %c0_10 = arith.constant 0 : index
    %c0_11 = arith.constant 0 : index
    %17 = vector.load %arg4[%c0_10, %c0_11] : memref<32x32xf32, #tpu.memory_space<vmem>>, vector<32x32xf32>
    %18 = arith.truncf %17 : vector<32x32xf32> to vector<32x32xbf16>
    %cst_12 = arith.constant dense<0.000000e+00> : vector<16x32xf32>
    %19 = tpu.matmul %16, %18, %cst_12 {dimension_numbers = #tpu.dot_dimension_numbers<[1], [0], [0], [1], [0, 0, 1, 1], [], []>} : vector<16x32xbf16>, vector<32x32xbf16>, vector<16x32xf32> -> vector<16x32xf32>
    %20 = arith.negf %19 : vector<16x32xf32>
    %21 = math.exp %20 : vector<16x32xf32>
    %cst_13 = arith.constant 1.000000e+00 : f32
    %22 = vector.broadcast %cst_13 : f32 to vector<16x32xf32>
    %23 = arith.addf %22, %21 : vector<16x32xf32>
    %24 = arith.divf %22, %23 : vector<16x32xf32>
    %25 = vector.shape_cast %24 : vector<16x32xf32> to vector<2x8x32xf32>
    %cst_14 = arith.constant 0.000000e+00 : f32
    %26 = vector.broadcast %cst_14 : f32 to vector<16x32xf32>
    %27 = vector.extract_strided_slice %25 {offsets = [0, 0, 0], sizes = [2, 8, 16], strides = [1, 1, 1]} : vector<2x8x32xf32> to vector<2x8x16xf32>
    %28 = arith.truncf %27 : vector<2x8x16xf32> to vector<2x8x16xbf16>
    %29 = vector.extract_strided_slice %14 {offsets = [0, 0, 0], sizes = [2, 8, 16], strides = [1, 1, 1]} : vector<2x8x32xf32> to vector<2x8x16xf32>
    %30 = arith.truncf %29 : vector<2x8x16xf32> to vector<2x8x16xbf16>
    %31 = vector.extract_strided_slice %0 {offsets = [0, 0, 0], sizes = [2, 8, 16], strides = [1, 1, 1]} : vector<2x8x32xf32> to vector<2x8x16xf32>
    %32 = arith.truncf %31 : vector<2x8x16xf32> to vector<2x8x16xbf16>
    "tpu.trace_start"() <{level = 10 : i32, message = "bqd,bkd->bqk"}> : () -> ()
    %cst_15 = arith.constant dense<0.000000e+00> : vector<2x8x8xf32>
    %33 = tpu.matmul %28, %30, %cst_15 {dimension_numbers = #tpu.dot_dimension_numbers<[2], [2], [1], [1], [0, 0, 0, 1, 1, 1], [0], [0]>} : vector<2x8x16xbf16>, vector<2x8x16xbf16>, vector<2x8x8xf32> -> vector<2x8x8xf32>
    "tpu.trace_stop"() : () -> ()
    %cst_16 = arith.constant 2.500000e-01 : f32
    %34 = vector.broadcast %cst_16 : f32 to vector<2x8x8xf32>
    %35 = arith.mulf %33, %34 : vector<2x8x8xf32>
    %cst_17 = arith.constant dense<0xFF800000> : vector<2x8xf32>
    %36 = vector.multi_reduction <maximumf>, %35, %cst_17 [2] : vector<2x8x8xf32> to vector<2x8xf32>
    %37 = vector.shape_cast %36 : vector<2x8xf32> to vector<2x8x1xf32>
    %38 = vector.broadcast %37 : vector<2x8x1xf32> to vector<2x8x8xf32>
    %39 = arith.subf %35, %38 : vector<2x8x8xf32>
    %40 = math.exp %39 : vector<2x8x8xf32>
    %cst_18 = arith.constant dense<0.000000e+00> : vector<2x8xf32>
    %41 = vector.multi_reduction <add>, %40, %cst_18 [2] : vector<2x8x8xf32> to vector<2x8xf32>
    %42 = vector.shape_cast %41 : vector<2x8xf32> to vector<2x8x1xf32>
    %43 = tpu.reciprocal %42 {approx = true} : vector<2x8x1xf32> -> vector<2x8x1xf32>
    %44 = vector.broadcast %43 : vector<2x8x1xf32> to vector<2x8x8xf32>
    %45 = arith.mulf %40, %44 : vector<2x8x8xf32>
    %46 = arith.truncf %45 : vector<2x8x8xf32> to vector<2x8x8xbf16>
    "tpu.trace_start"() <{level = 10 : i32, message = "bqk,bkd->bqd"}> : () -> ()
    %cst_19 = arith.constant dense<0.000000e+00> : vector<2x8x16xf32>
    %47 = tpu.matmul %46, %32, %cst_19 {dimension_numbers = #tpu.dot_dimension_numbers<[2], [1], [1], [2], [0, 0, 0, 1, 1, 2], [0], [0]>} : vector<2x8x8xbf16>, vector<2x8x16xbf16>, vector<2x8x16xf32> -> vector<2x8x16xf32>
    "tpu.trace_stop"() : () -> ()
    %48 = vector.shape_cast %47 : vector<2x8x16xf32> to vector<16x16xf32>
    %49 = arith.truncf %48 : vector<16x16xf32> to vector<16x16xbf16>
    %50 = vector.extract_strided_slice %5 {offsets = [0, 0], sizes = [16, 32], strides = [1, 1]} : vector<32x32xbf16> to vector<16x32xbf16>
    %cst_20 = arith.constant dense<0.000000e+00> : vector<16x32xf32>
    %51 = tpu.matmul %49, %50, %cst_20 {dimension_numbers = #tpu.dot_dimension_numbers<[1], [0], [0], [1], [0, 0, 1, 1], [], []>} : vector<16x16xbf16>, vector<16x32xbf16>, vector<16x32xf32> -> vector<16x32xf32>
    %52 = arith.addf %26, %51 : vector<16x32xf32>
    %53 = vector.extract_strided_slice %25 {offsets = [0, 0, 16], sizes = [2, 8, 16], strides = [1, 1, 1]} : vector<2x8x32xf32> to vector<2x8x16xf32>
    %54 = arith.truncf %53 : vector<2x8x16xf32> to vector<2x8x16xbf16>
    %55 = vector.extract_strided_slice %14 {offsets = [0, 0, 16], sizes = [2, 8, 16], strides = [1, 1, 1]} : vector<2x8x32xf32> to vector<2x8x16xf32>
    %56 = arith.truncf %55 : vector<2x8x16xf32> to vector<2x8x16xbf16>
    %57 = vector.extract_strided_slice %0 {offsets = [0, 0, 16], sizes = [2, 8, 16], strides = [1, 1, 1]} : vector<2x8x32xf32> to vector<2x8x16xf32>
    %58 = arith.truncf %57 : vector<2x8x16xf32> to vector<2x8x16xbf16>
    "tpu.trace_start"() <{level = 10 : i32, message = "bqd,bkd->bqk"}> : () -> ()
    %cst_21 = arith.constant dense<0.000000e+00> : vector<2x8x8xf32>
    %59 = tpu.matmul %54, %56, %cst_21 {dimension_numbers = #tpu.dot_dimension_numbers<[2], [2], [1], [1], [0, 0, 0, 1, 1, 1], [0], [0]>} : vector<2x8x16xbf16>, vector<2x8x16xbf16>, vector<2x8x8xf32> -> vector<2x8x8xf32>
    "tpu.trace_stop"() : () -> ()
    %cst_22 = arith.constant 2.500000e-01 : f32
    %60 = vector.broadcast %cst_22 : f32 to vector<2x8x8xf32>
    %61 = arith.mulf %59, %60 : vector<2x8x8xf32>
    %cst_23 = arith.constant dense<0xFF800000> : vector<2x8xf32>
    %62 = vector.multi_reduction <maximumf>, %61, %cst_23 [2] : vector<2x8x8xf32> to vector<2x8xf32>
    %63 = vector.shape_cast %62 : vector<2x8xf32> to vector<2x8x1xf32>
    %64 = vector.broadcast %63 : vector<2x8x1xf32> to vector<2x8x8xf32>
    %65 = arith.subf %61, %64 : vector<2x8x8xf32>
    %66 = math.exp %65 : vector<2x8x8xf32>
    %cst_24 = arith.constant dense<0.000000e+00> : vector<2x8xf32>
    %67 = vector.multi_reduction <add>, %66, %cst_24 [2] : vector<2x8x8xf32> to vector<2x8xf32>
    %68 = vector.shape_cast %67 : vector<2x8xf32> to vector<2x8x1xf32>
    %69 = tpu.reciprocal %68 {approx = true} : vector<2x8x1xf32> -> vector<2x8x1xf32>
    %70 = vector.broadcast %69 : vector<2x8x1xf32> to vector<2x8x8xf32>
    %71 = arith.mulf %66, %70 : vector<2x8x8xf32>
    %72 = arith.truncf %71 : vector<2x8x8xf32> to vector<2x8x8xbf16>
    "tpu.trace_start"() <{level = 10 : i32, message = "bqk,bkd->bqd"}> : () -> ()
    %cst_25 = arith.constant dense<0.000000e+00> : vector<2x8x16xf32>
    %73 = tpu.matmul %72, %58, %cst_25 {dimension_numbers = #tpu.dot_dimension_numbers<[2], [1], [1], [2], [0, 0, 0, 1, 1, 2], [0], [0]>} : vector<2x8x8xbf16>, vector<2x8x16xbf16>, vector<2x8x16xf32> -> vector<2x8x16xf32>
    "tpu.trace_stop"() : () -> ()
    %74 = vector.shape_cast %73 : vector<2x8x16xf32> to vector<16x16xf32>
    %75 = arith.truncf %74 : vector<16x16xf32> to vector<16x16xbf16>
    %76 = vector.extract_strided_slice %5 {offsets = [16, 0], sizes = [16, 32], strides = [1, 1]} : vector<32x32xbf16> to vector<16x32xbf16>
    %cst_26 = arith.constant dense<0.000000e+00> : vector<16x32xf32>
    %77 = tpu.matmul %75, %76, %cst_26 {dimension_numbers = #tpu.dot_dimension_numbers<[1], [0], [0], [1], [0, 0, 1, 1], [], []>} : vector<16x16xbf16>, vector<16x32xbf16>, vector<16x32xf32> -> vector<16x32xf32>
    %78 = arith.addf %52, %77 : vector<16x32xf32>
    %79 = vector.shape_cast %78 : vector<16x32xf32> to vector<2x8x32xf32>
    %c0_27 = arith.constant 0 : index
    %c0_28 = arith.constant 0 : index
    %80 = vector.load %arg6[%c0_27, %c0_28] : memref<1x32xf32, #tpu.memory_space<vmem>>, vector<1x32xf32>
    %81 = vector.shape_cast %80 : vector<1x32xf32> to vector<32xf32>
    %82 = vector.shape_cast %81 : vector<32xf32> to vector<1x1x32xf32>
    %83 = vector.broadcast %82 : vector<1x1x32xf32> to vector<2x8x32xf32>
    %84 = arith.addf %79, %83 : vector<2x8x32xf32>
    %c0_29 = arith.constant 0 : index
    %c0_30 = arith.constant 0 : index
    %c0_31 = arith.constant 0 : index
    %85 = vector.load %arg7[%c0_29, %c0_30, %c0_31] : memref<2x8x32xf32, #tpu.memory_space<vmem>>, vector<2x8x32xf32>
    tpu.vector_store %arg7[%c0_29, %c0_30, %c0_31], %84 {strides = array<i32>} : memref<2x8x32xf32, #tpu.memory_space<vmem>>, vector<2x8x32xf32>,
    return
  }
  func.func @transform_0(%arg0: i32) -> (i32, i32, i32) {
    %c0_i32 = arith.constant 0 : i32
    %c0_i32_0 = arith.constant 0 : i32
    %c0_i32_1 = arith.constant 0 : i32
    return %arg0, %c0_i32, %c0_i32_0 : i32, i32, i32
  }
  func.func @transform_1(%arg0: i32) -> (i32, i32, i32) {
    %c0_i32 = arith.constant 0 : i32
    %c0_i32_0 = arith.constant 0 : i32
    %c0_i32_1 = arith.constant 0 : i32
    return %arg0, %c0_i32, %c0_i32_0 : i32, i32, i32
  }
  func.func @transform_2(%arg0: i32) -> (i32, i32) {
    %c0_i32 = arith.constant 0 : i32
    %c0_i32_0 = arith.constant 0 : i32
    %c0_i32_1 = arith.constant 0 : i32
    return %c0_i32, %c0_i32_0 : i32, i32
  }
  func.func @transform_3(%arg0: i32) -> (i32, i32) {
    %c0_i32 = arith.constant 0 : i32
    %c0_i32_0 = arith.constant 0 : i32
    %c0_i32_1 = arith.constant 0 : i32
    return %c0_i32, %c0_i32_0 : i32, i32
  }
  func.func @transform_4(%arg0: i32) -> (i32, i32) {
    %c0_i32 = arith.constant 0 : i32
    %c0_i32_0 = arith.constant 0 : i32
    %c0_i32_1 = arith.constant 0 : i32
    return %c0_i32, %c0_i32_0 : i32, i32
  }
  func.func @transform_5(%arg0: i32) -> (i32, i32) {
    %c0_i32 = arith.constant 0 : i32
    %c0_i32_0 = arith.constant 0 : i32
    %c0_i32_1 = arith.constant 0 : i32
    return %c0_i32, %c0_i32_0 : i32, i32
  }
  func.func @transform_6(%arg0: i32) -> (i32, i32, i32) {
    %c0_i32 = arith.constant 0 : i32
    %c0_i32_0 = arith.constant 0 : i32
    %c0_i32_1 = arith.constant 0 : i32
    return %arg0, %c0_i32, %c0_i32_0 : i32, i32, i32
  }
}

</mosaic_0001>

<bundles_post_ra>
// kernel: tpu_custom_call.1
= control target key start
LH: loop header
LB: loop body
LE: loop exit
PB: predicated region body
PF: predicated region fallthrough
CT: control target
= control target key end

     0   :  { %11 = vsyncpa [#allocation3], 0  ;;  %s1343_s0 = inlined_call_operand.hbm [shape: f32[2,8,32], index: 0, kind: input, shape index: {}]   ;;  %s1344_s1 = inlined_call_operand.hbm [shape: f32[2,8,32], index: 1, kind: input, shape index: {}]   ;;  %s1345_s2 = inlined_call_operand.hbm [shape: f32[32,32], index: 2, kind: input, shape index: {}]   ;;  %s1346_s3 = inlined_call_operand.hbm [shape: f32[32,32], index: 3, kind: input, shape index: {}]   ;;  %s1347_s4 = inlined_call_operand.hbm [shape: f32[32,32], index: 4, kind: input, shape index: {}]   ;;  %s1348_s5 = inlined_call_operand.vmem [shape: f32[1,32], index: 5, kind: input, shape index: {}]   ;;  %s1349_s6 = inlined_call_operand.hbm [shape: f32[2,8,32], index: 6, kind: output, shape index: {}]  }
   0x1   :  { %12 = vsyncpa [#allocation6], 0 }
   0x2   :  { %13 = vsyncpa [#allocation9], 0 }
   0x3   :  { %14 = vsyncpa [#allocation4], 0  ;;  %s1099_s21 = smov [#allocation5]   ;;  %s1100_s23 = smov [#allocation8]  }
   0x4   :  { %s32_s22 = sshll.u32 %s1099_s21, 4  ;;  %s56_s24 = sshll.u32 %s1100_s23, 4  ;;  %s33_s22 = int_to_ptr.vmem [resolvable:$true] %s32_s22  ;;  %s1145_s24 = int_to_ptr.vmem [resolvable:$true] %s56_s24 }
   0x5   :  { %s959_s27 = scalar_lea.hbm %s1344_s1, 256 }
   0x6   :  { %p960_p0 = scmp.ne.s32.totalorder %s1344_s1, %s959_s27  ;;  %p963_p1 = scmp.lt.u32.totalorder %s959_s27, %s1344_s1 }
   0x8   :  { %p965_p2 = pnand %p963_p1, %p960_p0 }
   0xa   :  { %968 = shalt.err (!%p965_p2)
}
   0xb   :  { %s969_s8 = scalar_lea.vmem %s33_s22, 256  ;;  %p974_p4 = scmp.lt.s32.totalorder %s33_s22, %s33_s22 }
   0xc   :  { %p970_p3 = scmp.ne.s32.totalorder %s33_s22, %s969_s8  ;;  %p975_p5 = scmp.lt.s32.totalorder %s969_s8, %s969_s8 }
   0xe   :  { %p976_p6 = por %p975_p5, %p974_p4 }
  0x10   :  { %p977_p7 = pnand %p976_p6, %p970_p3 }
  0x12   :  { %980 = shalt.err (!%p977_p7)
}
  0x13   :  { %s1101_s9 = smov 128   ;;  %s1102_s10 = smov 8  }
  0x14   :  { %38 = dma.hbm_to_vmem [thread:$0]  %s1344_s1, 256, %s33_s22, [#allocation6], %s1101_s9, %s1101_s9, %s1102_s10  }
  0x15   :  { %s981_s15 = scalar_lea.hbm %s1346_s3, 512 }
  0x16   :  { %p982_p8 = scmp.ne.s32.totalorder %s1346_s3, %s981_s15  ;;  %p985_p9 = scmp.lt.u32.totalorder %s981_s15, %s1346_s3 }
  0x18   :  { %p987_p10 = pnand %p985_p9, %p982_p8 }
  0x1a   :  { %990 = shalt.err (!%p987_p10)
}
  0x1b   :  { %s991_s20 = scalar_lea.vmem %s1145_s24, 512  ;;  %p996_p12 = scmp.lt.s32.totalorder %s1145_s24, %s1145_s24 }
  0x1c   :  { %p992_p11 = scmp.ne.s32.totalorder %s1145_s24, %s991_s20  ;;  %p997_p13 = scmp.lt.s32.totalorder %s991_s20, %s991_s20 }
  0x1e   :  { %p998_p0 = por %p997_p13, %p996_p12 }
  0x20   :  { %p999_p1 = pnand %p998_p0, %p992_p11 }
  0x22   :  { %1002 = shalt.err (!%p999_p1)
}
  0x23   :  { %62 = dma.hbm_to_vmem [thread:$0]  %s1346_s3, 512, %s1145_s24, [#allocation9], %s1101_s9, %s1101_s9, %s1102_s10  }
  0x24   :  { %s1103_s22 = smov [#allocation2]   ;;  %s1104_s25 = smov [#allocation7]  }
  0x25   :  { %s20_s23 = sshll.u32 %s1103_s22, 4  ;;  %s44_s26 = sshll.u32 %s1104_s25, 4  ;;  %s21_s23 = int_to_ptr.vmem [resolvable:$true] %s20_s23  ;;  %s1182_s26 = int_to_ptr.vmem [resolvable:$true] %s44_s26 }
  0x26   :  { %s1003_s29 = scalar_lea.hbm %s1343_s0, 256 }
  0x27   :  { %p1004_p2 = scmp.ne.s32.totalorder %s1343_s0, %s1003_s29  ;;  %p1007_p3 = scmp.lt.u32.totalorder %s1003_s29, %s1343_s0 }
  0x29   :  { %p1009_p4 = pnand %p1007_p3, %p1004_p2 }
  0x2b   :  { %1012 = shalt.err (!%p1009_p4)
}
  0x2c   :  { %s1013_s3 = scalar_lea.vmem %s21_s23, 256  ;;  %p1018_p6 = scmp.lt.s32.totalorder %s21_s23, %s21_s23 }
  0x2d   :  { %p1014_p5 = scmp.ne.s32.totalorder %s21_s23, %s1013_s3  ;;  %p1019_p7 = scmp.lt.s32.totalorder %s1013_s3, %s1013_s3 }
  0x2f   :  { %p1020_p8 = por %p1019_p7, %p1018_p6 }
  0x31   :  { %p1021_p9 = pnand %p1020_p8, %p1014_p5 }
  0x33   :  { %1024 = shalt.err (!%p1021_p9)
}
  0x34   :  { %26 = dma.hbm_to_vmem [thread:$0]  %s1343_s0, 256, %s21_s23, [#allocation3], %s1101_s9, %s1101_s9, %s1102_s10  }
  0x35   :  { %s1025_s15 = scalar_lea.hbm %s1345_s2, 512 }
  0x36   :  { %p1026_p10 = scmp.ne.s32.totalorder %s1345_s2, %s1025_s15  ;;  %p1029_p11 = scmp.lt.u32.totalorder %s1025_s15, %s1345_s2 }
  0x38   :  { %p1031_p12 = pnand %p1029_p11, %p1026_p10 }
  0x3a   :  { %1034 = shalt.err (!%p1031_p12)
}
  0x3b   :  { %s1035_s20 = scalar_lea.vmem %s1182_s26, 512  ;;  %p1040_p0 = scmp.lt.s32.totalorder %s1182_s26, %s1182_s26 }
  0x3c   :  { %p1036_p13 = scmp.ne.s32.totalorder %s1182_s26, %s1035_s20  ;;  %p1041_p1 = scmp.lt.s32.totalorder %s1035_s20, %s1035_s20 }
  0x3e   :  { %p1042_p2 = por %p1041_p1, %p1040_p0 }
  0x40   :  { %p1043_p3 = pnand %p1042_p2, %p1036_p13 }
  0x42   :  { %1046 = shalt.err (!%p1043_p3)
}
  0x43   :  { %50 = dma.hbm_to_vmem [thread:$0]  %s1345_s2, 512, %s1182_s26, [#allocation6], %s1101_s9, %s1101_s9, %s1102_s10  }
  0x44   :  { %s1105_s21 = smov [#allocation10]   ;;  %s1047_s27 = scalar_lea.hbm %s1347_s4, 512 }
  0x45   :  { %s68_s22 = sshll.u32 %s1105_s21, 4  ;;  %p1048_p4 = scmp.ne.s32.totalorder %s1347_s4, %s1047_s27  ;;  %s69_s22 = int_to_ptr.vmem [resolvable:$true] %s68_s22 }
  0x46   :  { %p1051_p5 = scmp.lt.u32.totalorder %s1047_s27, %s1347_s4 }
  0x48   :  { %p1053_p6 = pnand %p1051_p5, %p1048_p4 }
  0x4a   :  { %1056 = shalt.err (!%p1053_p6)
}
  0x4b   :  { %s1057_s8 = scalar_lea.vmem %s69_s22, 512  ;;  %p1062_p8 = scmp.lt.s32.totalorder %s69_s22, %s69_s22 }
  0x4c   :  { %p1058_p7 = scmp.ne.s32.totalorder %s69_s22, %s1057_s8  ;;  %p1063_p9 = scmp.lt.s32.totalorder %s1057_s8, %s1057_s8 }
  0x4e   :  { %p1064_p10 = por %p1063_p9, %p1062_p8 }
  0x50   :  { %p1065_p11 = pnand %p1064_p10, %p1058_p7 }
  0x52   :  { %1068 = shalt.err (!%p1065_p11)
}
  0x53   :  { %74 = dma.hbm_to_vmem [thread:$0]  %s1347_s4, 512, %s69_s22, [#allocation9], %s1101_s9, %s1101_s9, %s1102_s10  }
  0x54   :  { %1091 = dma.done.wait [#allocation3], 256  }
  0x55   :  { %1092 = vsyncadd [#allocation3], 4294967040 }
  0x56   :  { %1093 = dma.done.wait [#allocation6], 768  }
  0x57   :  { %1094 = vsyncadd [#allocation6], 4294966528 }
  0x58   :  { %1095 = dma.done.wait [#allocation9], 1024  }
  0x59   :  { %1096 = vsyncadd [#allocation9], 4294966272  ;;  %v1106_v0 = vmov 0.0   ;;  %vm1107_vm0 = vmmov 0   ;;  %v97_v1 = vld [vmem:[#allocation7] sm:$0xff]  ;;  %v98_v2 = vld [vmem:[#allocation7 + $0x8] sm:$0xff] }
  0x5a   :  { %840 = vmatprep.subr.bf16.mxu0 %v1106_v0  ;;  %848 = vmatprep.subr.bf16.mxu1 %v1106_v0  ;;  %v99_v3 = vld [vmem:[#allocation7 + $0x10] sm:$0xff]  ;;  %v101_v4 = vpack.c.bf16 %v98_v2, %v97_v1  ;;  %v100_v5 = vld [vmem:[#allocation7 + $0x18] sm:$0xff]  ;;  %v168_v6 = vld [vmem:[#allocation8] sm:$0xff]  ;;  %vm110_vm1 = vcmask 261120   ;;  %vm236_vm2 = vcmask 130048   ;;  %s1108_s4 = smov 112  }
  0x5b   :  { %844 = vmatprep.mubr.msk.bf16.mxu0 %vm1107_vm0, %v1106_v0  ;;  %852 = vmatprep.mubr.msk.bf16.mxu1 %vm1107_vm0, %v1106_v0  ;;  %v169_v7 = vld [vmem:[#allocation8 + $0x8] sm:$0xff]  ;;  %v170_v9 = vld [vmem:[#allocation8 + $0x10] sm:$0xff]  ;;  %v102_v10 = vpack.c.bf16 %v100_v5, %v99_v3  ;;  %v1240_v11 = vld [vmem:[#allocation2] sm:$0xff]  ;;  %vm331_vm3 = vcmask 64512   ;;  %vm359_vm4 = vcmask 1043456   ;;  %s1109_s24 = smov [#allocation11]  }
  0x5c   :  { %v172_v8 = vpack.c.bf16 %v169_v7, %v168_v6  ;;  %841 = vmatpush3.bf16.msra.mxu0 %v101_v4  ;;  %v1242_v12 = vld [vmem:[#allocation2 + $0x8] sm:$0xff]  ;;  %v171_v13 = vld [vmem:[#allocation8 + $0x18] sm:$0xff]  ;;  %v95_v15 = vld [vmem:[#allocation5] sm:$0xff]  ;;  %s783_s12 = sshll.u32 %s1109_s24, 4  ;;  %s784_s12 = int_to_ptr.vmem [resolvable:$true] %s783_s12 }
  0x5d   :  { %842 = vmatprep.subr.bf16.mxu0 %v1106_v0  ;;  %v173_v14 = vpack.c.bf16 %v171_v13, %v170_v9  ;;  %v96_v16 = vld [vmem:[#allocation5 + $0x8] sm:$0xff]  ;;  %v109_v17 = vpack.c.bf16 %v1242_v12, %v1240_v11  ;;  %s1069_s13 = scalar_lea.vmem %s784_s12, 256  ;;  %p1074_p13 = scmp.lt.s32.totalorder %s784_s12, %s784_s12 }
  0x5e   :  { %849 = vmatpush3.bf16.msra.mxu1 %v172_v8  ;;  %v167_v18 = vpack.c.bf16 %v96_v16, %v95_v15  ;;  %v1274_v8 = vpack.c.bf16 %v1240_v11, %v1240_v11  ;;  %p1070_p12 = scmp.ne.s32.totalorder %s784_s12, %s1069_s13  ;;  %p1075_p0 = scmp.lt.s32.totalorder %s1069_s13, %s1069_s13 }
  0x5f   :  { %850 = vmatprep.subr.bf16.mxu1 %v1106_v0 }
  0x60   :  { %843 = vmatpush3.bf16.msra.mxu0 %v102_v10  ;;  %v361_v9 = vsel %vm359_vm4, %v1274_v8, 0  ;;  %v235_v10 = vpack.c.bf16 %v1242_v12, %v1242_v12  ;;  %p1076_p1 = por %p1075_p0, %p1074_p13 }
  0x61   :  { %856 = vmatprep.subr.bf16.mxu0 %v1106_v0 }
  0x62   :  { %851 = vmatpush3.bf16.msra.mxu1 %v173_v14  ;;  %v407_v13 = vsel %vm359_vm4, %v235_v10, 0  ;;  %p1077_p2 = pnand %p1076_p1, %p1070_p12 }
  0x63   :  { %862 = vmatprep.subr.bf16.mxu1 %v1106_v0  ;;  %845 = vmatmul.mubr.msk.bf16.vlgmr.msra.gmra.mrb[0].mxu0 %vm110_vm1, %v109_v17 }
  0x64   :  { %858 = vmatprep.mubr.msk.bf16.mxu0 %vm1107_vm0, %v1106_v0 }
  0x65   :  { %853 = vmatmul.mubr.msk.bf16.vlgmr.msra.gmra.mrb[0].mxu1 %vm110_vm1, %v167_v18 }
  0x66   :  { %864 = vmatprep.mubr.msk.bf16.mxu1 %vm1107_vm0, %v1106_v0 }
 0x136   :  { %v148_v19 = vpop.f32.mrb[0].mxu0 }
 0x137   :  { %v798_v20 = vmul.f32 -1.442695, %v148_v19  ;;  %v846_v21 = vpop.f32.mrb[1].mxu0 }
 0x138   :  { %v211_v22 = vpop.f32.mrb[0].mxu1  ;;  %v151_v23 = vpop.f32.mrb[2].mxu0 }
 0x139   :  { %v801_v24 = vmul.f32 -1.442695, %v211_v22  ;;  %v854_v25 = vpop.f32.mrb[1].mxu1  ;;  %927 = vpow2.f32 %v798_v20  ;;  %v799_v26 = vmul.f32 -1.442695, %v151_v23  ;;  %v847_v27 = vpop.f32.mrb[3].mxu0 }
 0x13a   :  { %v214_v28 = vpop.f32.mrb[2].mxu1 }
 0x13b   :  { %929 = vpow2.f32 %v801_v24  ;;  %v802_v29 = vmul.f32 -1.442695, %v214_v28  ;;  %v855_v30 = vpop.f32.mrb[3].mxu1 }
 0x13c   :  { %931 = vpow2.f32 %v799_v26 }
 0x13d   :  { %933 = vpow2.f32 %v802_v29 }
 0x143   :  { %v928_v31 = vpop.eup %927 }
 0x144   :  { %v161_v33 = vadd.f32 1.0, %v928_v31 }
 0x145   :  { %v930_v32 = vpop.eup %929 }
 0x146   :  { %v932_v34 = vpop.eup %931  ;;  %935 = vrcp.f32 %v161_v33  ;;  %v224_v36 = vadd.f32 1.0, %v930_v32 }
 0x147   :  { %v162_v35 = vadd.f32 1.0, %v932_v34  ;;  %v934_v37 = vpop.eup %933 }
 0x148   :  { %v225_v38 = vadd.f32 1.0, %v934_v37 }
 0x149   :  { %937 = vrcp.f32 %v162_v35 }
 0x14a   :  { %939 = vrcp.f32 %v224_v36 }
 0x14b   :  { %941 = vrcp.f32 %v225_v38 }
 0x150   :  { %v936_v39 = vpop.eup %935 }
 0x151   :  { %v232_v40 = vpack.c.bf16 %v936_v39, %v936_v39 }
 0x153   :  { %v938_v41 = vpop.eup %937  ;;  %v241_v42 = vsel %vm236_vm2, %v232_v40, 0 }
 0x154   :  { %v233_v43 = vpack.c.bf16 %v938_v41, %v938_v41  ;;  %v940_v44 = vpop.eup %939  ;;  %857 = vmatpush3.bf16.xpose.msra.mxu0 %v241_v42 }
 0x155   :  { %868 = vmatprep.subr.bf16.mxu0 %v1106_v0  ;;  %v230_v46 = vpack.c.bf16 %v940_v44, %v940_v44  ;;  %v942_v47 = vpop.eup %941 }
 0x156   :  { %506 = vrot.lane.b32.xlu1 %v233_v43, %s1108_s4  ;;  %v287_v45 = vsel %vm236_vm2, %v233_v43, 0  ;;  %v231_v48 = vpack.c.bf16 %v942_v47, %v942_v47 }
 0x157   :  { %863 = vmatpush3.bf16.xpose.msra.mxu1 %v287_v45 }
 0x158   :  { %874 = vmatprep.subr.bf16.mxu1 %v1106_v0 }
 0x15b   :  { %859 = vmatmul.mubr.msk.bf16.vlgmr.msra.gmra.mrb[4].mxu0 %vm236_vm2, %v230_v46 }
 0x15c   :  { %870 = vmatprep.mubr.msk.bf16.mxu0 %vm1107_vm0, %v1106_v0  ;;  %869 = vmatpush3.bf16.msra.mxu0 %v361_v9  ;;  %v105_v9 = vld [vmem:[#allocation10 + $0x10] sm:$0xff] }
 0x15d   :  { %880 = vmatprep.subr.bf16.mxu0 %v1106_v0 }
 0x15e   :  { %865 = vmatmul.mubr.msk.bf16.vlgmr.msra.gmra.mrb[4].mxu1 %vm236_vm2, %v231_v48 }
 0x15f   :  { %876 = vmatprep.mubr.msk.bf16.mxu1 %vm1107_vm0, %v1106_v0  ;;  %875 = vmatpush3.bf16.msra.mxu1 %v407_v13 }
 0x160   :  { %886 = vmatprep.subr.bf16.mxu1 %v1106_v0 }
 0x1c8   :  { %v507_v11 = vpop.permute.xlu1 %506 }
 0x1c9   :  { %v512_v23 = vsel %vm236_vm2, %v507_v11, 0 }
 0x22e   :  { %v277_v49 = vpop.f32.mrb[4].mxu0 }
 0x22f   :  { %v329_v50 = vmul.f32 0.25, %v277_v49  ;;  %v860_v51 = vpop.f32.mrb[5].mxu0 }
 0x230   :  { %v280_v52 = vpop.f32.mrb[6].mxu0 }
 0x231   :  { %v323_v53 = vpop.f32.mrb[4].mxu1  ;;  %v861_v55 = vpop.f32.mrb[7].mxu0  ;;  %v332_v57 = vsel %vm331_vm3, %v329_v50, -inf }
 0x232   :  { %v330_v54 = vmul.f32 0.25, %v323_v53  ;;  %v866_v56 = vpop.f32.mrb[5].mxu1  ;;  %333 = vmax.xlane.f32.xlu0 %v332_v57 }
 0x233   :  { %v326_v58 = vpop.f32.mrb[6].mxu1 }
 0x234   :  { %v867_v59 = vpop.f32.mrb[7].mxu1  ;;  %v335_v60 = vsel %vm331_vm3, %v330_v54, -inf }
 0x236   :  { %336 = vmax.xlane.f32.xlu0 %v335_v60 }
 0x24c   :  { %454 = vrot.lane.b32.xlu0 %v232_v40, %s1108_s4 }
 0x2bf   :  { %v334_v61 = vpop.xlane.xlu0 %333 }
 0x2c0   :  { %v338_v62 = vsub.f32 %v329_v50, %v334_v61 }
 0x2c2   :  { %v340_v63 = vmul.f32 1.442695, %v338_v62 }
 0x2c3   :  { %v337_v1 = vpop.xlane.xlu0 %336 }
 0x2c4   :  { %943 = vpow2.f32 %v340_v63  ;;  %v339_v2 = vsub.f32 %v330_v54, %v337_v1 }
 0x2c6   :  { %v342_v3 = vmul.f32 1.442695, %v339_v2 }
 0x2c7   :  { %v455_v18 = vpop.permute.xlu0 %454 }
 0x2c8   :  { %945 = vpow2.f32 %v342_v3  ;;  %v460_v12 = vsel %vm236_vm2, %v455_v18, 0  ;;  %v103_v3 = vld [vmem:[#allocation10] sm:$0xff] }
 0x2ce   :  { %v944_v4 = vpop.eup %943 }
 0x2cf   :  { %v344_v5 = vsel %vm331_vm3, %v944_v4, 0.0 }
 0x2d0   :  { %345 = vadd.xlane.f32.xlu1 %v344_v5 }
 0x2d2   :  { %v946_v6 = vpop.eup %945 }
 0x2d3   :  { %v347_v7 = vsel %vm331_vm3, %v946_v6, 0.0 }
 0x2d4   :  { %348 = vadd.xlane.f32.xlu1 %v347_v7 }
 0x2e5   :  { %451 = vrot.lane.b32.xlu1 %v230_v46, %s1108_s4 }
 0x2e9   :  { %503 = vrot.lane.b32.xlu1 %v231_v48, %s1108_s4 }
 0x35d   :  { %v346_v14 = vpop.xlane.xlu1 %345 }
 0x35e   :  { %947 = vrcp.f32 %v346_v14 }
 0x361   :  { %v349_v15 = vpop.xlane.xlu1 %348 }
 0x362   :  { %949 = vrcp.f32 %v349_v15 }
 0x365   :  { %v452_v24 = vpop.permute.xlu1 %451 }
 0x368   :  { %v948_v16 = vpop.eup %947 }
 0x369   :  { %v352_v17 = vmul.f32 %v948_v16, %v944_v4  ;;  %v504_v25 = vpop.permute.xlu1 %503  ;;  %v104_v4 = vld [vmem:[#allocation10 + $0x8] sm:$0xff] }
 0x36a   :  { %v107_v7 = vpack.c.bf16 %v104_v4, %v103_v3 }
 0x36b   :  { %v354_v19 = vpack.c.bf16 %v352_v17, %v352_v17 }
 0x36c   :  { %v950_v20 = vpop.eup %949 }
 0x36d   :  { %v353_v21 = vmul.f32 %v950_v20, %v946_v6  ;;  %871 = vmatmul.mubr.msk.bf16.vlgmr.msra.gmra.mrb[8].mxu0 %vm331_vm3, %v354_v19 }
 0x36e   :  { %881 = vmatpush3.bf16.xpose.msra.mxu0 %v460_v12  ;;  %882 = vmatprep.mubr.msk.bf16.mxu0 %vm1107_vm0, %v1106_v0 }
 0x36f   :  { %v355_v22 = vpack.c.bf16 %v353_v21, %v353_v21  ;;  %892 = vmatprep.subr.bf16.mxu0 %v1106_v0 }
 0x371   :  { %877 = vmatmul.mubr.msk.bf16.vlgmr.msra.gmra.mrb[8].mxu1 %vm331_vm3, %v355_v22 }
 0x372   :  { %887 = vmatpush3.bf16.xpose.msra.mxu1 %v512_v23  ;;  %888 = vmatprep.mubr.msk.bf16.mxu1 %vm1107_vm0, %v1106_v0 }
 0x373   :  { %898 = vmatprep.subr.bf16.mxu1 %v1106_v0 }
 0x375   :  { %883 = vmatmul.mubr.msk.bf16.vlgmr.msra.gmra.mrb[12].mxu0 %vm236_vm2, %v452_v24 }
 0x376   :  { %894 = vmatprep.mubr.msk.bf16.mxu0 %vm1107_vm0, %v1106_v0 }
 0x379   :  { %889 = vmatmul.mubr.msk.bf16.vlgmr.msra.gmra.mrb[12].mxu1 %vm236_vm2, %v504_v25  ;;  %v813_v25 = vld [vmem:[%s1348_s5] ss:$0 sm:$0xff] }
 0x37a   :  { %900 = vmatprep.mubr.msk.bf16.mxu1 %vm1107_vm0, %v1106_v0 }
 0x440   :  { %v1301_v26 = vpop.f32.mrb[8].mxu0 }
 0x441   :  { %v872_v27 = vpop.f32.mrb[9].mxu0 }
 0x442   :  { %v400_v28 = vpop.f32.mrb[10].mxu0 }
 0x443   :  { %v873_v29 = vpop.f32.mrb[11].mxu0 }
 0x444   :  { %v443_v30 = vpop.f32.mrb[8].mxu1 }
 0x445   :  { %v449_v31 = vpack.c.bf16 %v443_v30, %v1301_v26  ;;  %v878_v32 = vpop.f32.mrb[9].mxu1 }
 0x446   :  { %v446_v33 = vpop.f32.mrb[10].mxu1 }
 0x447   :  { %v879_v34 = vpop.f32.mrb[11].mxu1 }
 0x448   :  { %v496_v35 = vpop.f32.mrb[12].mxu0 }
 0x449   :  { %v554_v36 = vmul.f32 0.25, %v496_v35  ;;  %v884_v37 = vpop.f32.mrb[13].mxu0 }
 0x44a   :  { %v499_v38 = vpop.f32.mrb[14].mxu0 }
 0x44b   :  { %v885_v39 = vpop.f32.mrb[15].mxu0  ;;  %v556_v40 = vsel %vm331_vm3, %v554_v36, -inf }
 0x44c   :  { %v548_v41 = vpop.f32.mrb[12].mxu1  ;;  %557 = vmax.xlane.f32.xlu0 %v556_v40 }
 0x44d   :  { %v555_v42 = vmul.f32 0.25, %v548_v41  ;;  %v890_v43 = vpop.f32.mrb[13].mxu1 }
 0x44e   :  { %v551_v44 = vpop.f32.mrb[14].mxu1 }
 0x44f   :  { %v891_v45 = vpop.f32.mrb[15].mxu1  ;;  %v559_v46 = vsel %vm331_vm3, %v555_v42, -inf }
 0x450   :  { %560 = vmax.xlane.f32.xlu1 %v559_v46 }
 0x461   :  { %630 = vrot.lane.b32.xlu1 %v235_v10, %s1108_s4  ;;  %v106_v10 = vld [vmem:[#allocation10 + $0x18] sm:$0xff] }
 0x462   :  { %v108_v13 = vpack.c.bf16 %v106_v10, %v105_v9 }
 0x4d9   :  { %v558_v47 = vpop.xlane.xlu0 %557 }
 0x4da   :  { %v562_v48 = vsub.f32 %v554_v36, %v558_v47 }
 0x4dc   :  { %v564_v49 = vmul.f32 1.442695, %v562_v48 }
 0x4dd   :  { %v561_v50 = vpop.xlane.xlu1 %560 }
 0x4de   :  { %951 = vpow2.f32 %v564_v49  ;;  %v563_v51 = vsub.f32 %v555_v42, %v561_v50 }
 0x4e0   :  { %v566_v52 = vmul.f32 1.442695, %v563_v51 }
 0x4e1   :  { %v631_v57 = vpop.permute.xlu1 %630 }
 0x4e2   :  { %953 = vpow2.f32 %v566_v52  ;;  %v636_v58 = vsel %vm359_vm4, %v631_v57, 0 }
 0x4e3   :  { %899 = vmatpush3.bf16.msra.mxu1 %v636_v58 }
 0x4e4   :  { %910 = vmatprep.subr.bf16.mxu1 %v1106_v0 }
 0x4e8   :  { %v952_v53 = vpop.eup %951 }
 0x4e9   :  { %v568_v54 = vsel %vm331_vm3, %v952_v53, 0.0 }
 0x4ea   :  { %569 = vadd.xlane.f32.xlu0 %v568_v54 }
 0x4ec   :  { %v954_v55 = vpop.eup %953 }
 0x4ed   :  { %v571_v56 = vsel %vm331_vm3, %v954_v55, 0.0 }
 0x4ee   :  { %572 = vadd.xlane.f32.xlu0 %v571_v56 }
 0x504   :  { %581 = vrot.lane.b32.xlu0 %v1274_v8, %s1108_s4 }
 0x577   :  { %v570_v59 = vpop.xlane.xlu0 %569 }
 0x578   :  { %955 = vrcp.f32 %v570_v59 }
 0x57b   :  { %v573_v60 = vpop.xlane.xlu0 %572 }
 0x57c   :  { %957 = vrcp.f32 %v573_v60 }
 0x57f   :  { %v582_v61 = vpop.permute.xlu0 %581 }
 0x580   :  { %v587_v62 = vsel %vm359_vm4, %v582_v61, 0 }
 0x581   :  { %893 = vmatpush3.bf16.msra.mxu0 %v587_v62 }
 0x582   :  { %v956_v63 = vpop.eup %955  ;;  %904 = vmatprep.subr.bf16.mxu0 %v1106_v0 }
 0x583   :  { %v576_v1 = vmul.f32 %v956_v63, %v952_v53 }
 0x585   :  { %v578_v2 = vpack.c.bf16 %v576_v1, %v576_v1 }
 0x586   :  { %v958_v5 = vpop.eup %957 }
 0x587   :  { %v577_v6 = vmul.f32 %v958_v5, %v954_v55  ;;  %895 = vmatmul.mubr.msk.bf16.vlgmr.msra.gmra.mrb[16].mxu0 %vm331_vm3, %v578_v2 }
 0x588   :  { %906 = vmatprep.mubr.msk.bf16.mxu0 %vm1107_vm0, %v1106_v0  ;;  %905 = vmatpush3.bf16.msra.mxu0 %v108_v13 }
 0x589   :  { %v579_v8 = vpack.c.bf16 %v577_v6, %v577_v6 }
 0x58b   :  { %901 = vmatmul.mubr.msk.bf16.vlgmr.msra.gmra.mrb[16].mxu1 %vm331_vm3, %v579_v8 }
 0x58c   :  { %911 = vmatpush3.bf16.msra.mxu1 %v107_v7  ;;  %912 = vmatprep.mubr.msk.bf16.mxu1 %vm1107_vm0, %v1106_v0 }
 0x593   :  { %913 = vmatmul.mubr.msk.bf16.vlgmr.msra.gmra.mrb[20].mxu1 %vm236_vm2, %v449_v31 }
 0x65a   :  { %v623_v11 = vpop.f32.mrb[16].mxu0 }
 0x65b   :  { %v896_v14 = vpop.f32.mrb[17].mxu0 }
 0x65c   :  { %v626_v15 = vpop.f32.mrb[18].mxu0 }
 0x65d   :  { %v897_v16 = vpop.f32.mrb[19].mxu0 }
 0x65e   :  { %v672_v17 = vpop.f32.mrb[16].mxu1 }
 0x65f   :  { %v678_v18 = vpack.c.bf16 %v672_v17, %v623_v11  ;;  %v902_v19 = vpop.f32.mrb[17].mxu1 }
 0x660   :  { %v675_v20 = vpop.f32.mrb[18].mxu1 }
 0x661   :  { %v903_v12 = vpop.f32.mrb[19].mxu1  ;;  %907 = vmatmul.mubr.msk.bf16.vlgmr.msra.gmra.mrb[20].mxu0 %vm236_vm2, %v678_v18 }
 0x666   :  { %v760_v21 = vpop.f32.mrb[20].mxu1 }
 0x667   :  { %v914_v22 = vpop.f32.mrb[21].mxu1 }
 0x668   :  { %v763_v0 = vpop.f32.mrb[22].mxu1 }
 0x669   :  { %v915_v23 = vpop.f32.mrb[23].mxu1 }
 0x734   :  { %v716_v24 = vpop.f32.mrb[20].mxu0 }
 0x735   :  { %v761_v26 = vadd.f32 %v760_v21, %v716_v24  ;;  %v908_v27 = vpop.f32.mrb[21].mxu0 }
 0x736   :  { %v719_v28 = vpop.f32.mrb[22].mxu0 }
 0x737   :  { %v774_v29 = vadd.f32 %v813_v25, %v761_v26  ;;  %v764_v30 = vadd.f32 %v763_v0, %v719_v28  ;;  %v909_v31 = vpop.f32.mrb[23].mxu0 }
 0x739   :  { %776 = vst.msk [vmem:[#allocation11] sm:$0xff] %vm110_vm1, %v774_v29  ;;  %v775_v32 = vadd.f32 %v813_v25, %v764_v30 }
 0x73b   :  { %777 = vst.msk [vmem:[#allocation11 + $0x8] sm:$0xff] %vm110_vm1, %v775_v32 }
 0x73c   :  { %1080 = shalt.err (!%p1077_p2)
}
 0x73d   :  { %s1081_s15 = scalar_lea.hbm %s1349_s6, 256 }
 0x73e   :  { %p1082_p3 = scmp.ne.s32.totalorder %s1349_s6, %s1081_s15  ;;  %p1085_p4 = scmp.lt.u32.totalorder %s1081_s15, %s1349_s6 }
 0x740   :  { %p1087_p5 = pnand %p1085_p4, %p1082_p3 }
 0x742   :  { %1090 = shalt.err (!%p1087_p5)
}
 0x743   :  { %789 = dma.vmem_to_hbm [thread:$0]  %s784_s12, 256, %s1349_s6, [#allocation4], %s1101_s9, %s1101_s9, %s1102_s10  }
 0x744   :  { %1097 = dma.done.wait [#allocation4], 256  }
 0x745   :  { %1098 = vsyncadd [#allocation4], 4294967040 }
 0x746   :  { %793 = vsyncpa [#allocation3], 1 }
 0x747   :  { %794 = vsyncpa [#allocation6], 1 }
 0x748   :  { %795 = vsyncpa [#allocation9], 1 }
 0x749   :  { %796 = vsyncpa [#allocation4], 1 }

</bundles_post_ra>
